<compile_context>
chip_gen: v7x
topology: tpu7x:2x2x1
jax: 0.10.0
libtpu: 0.0.40
codegen_flags: <defaults>
</compile_context>

<pallas_src>
import jax
import jax.numpy as jnp
from jax.experimental import pallas as pl
from jax.experimental.pallas import tpu as pltpu


def _round_up(x, m):
    return ((x + m - 1) // m) * m


def dense_elu_kernel(x_ref, w_ref, b_ref, o_ref, acc_ref):
    # x_ref: (tm, tk), w_ref: (tk, tn), b_ref: (1, tn) f32,
    # o_ref: (tm, tn), acc_ref: (tm, tn) f32 scratch, resident across K steps.
    k = pl.program_id(2)

    prod = jnp.dot(x_ref[...], w_ref[...], preferred_element_type=jnp.float32)

    @pl.when(k == 0)
    def _first():
        # Fold the bias into the first partial product: saves the zero-fill
        # pass over the accumulator and the separate epilogue bias add.
        acc_ref[...] = prod + b_ref[...]

    @pl.when(k > 0)
    def _rest():
        acc_ref[...] += prod

    @pl.when(k == pl.num_programs(2) - 1)
    def _epilogue():
        y = acc_ref[...]
        # ELU(alpha=1): y if y > 0 else exp(y) - 1   (all f32 math).
        # TODO(synk): switch to jnp.expm1 if/when Mosaic guarantees a lowering.
        o_ref[...] = jnp.where(y > 0, y, jnp.exp(y) - 1.0).astype(o_ref.dtype)


def dense_elu(x, w, b, *, tm=512, tn=512, tk=512, compute_dtype=None,
              weight_buffers=2):
    """Fused Linear + ELU.

    x: (B, I); w: (I, O); b: (O,). Returns (B, O) in x.dtype.
    The matmul runs on the MXU in `compute_dtype` (default: x.dtype; pass
    jnp.bfloat16 for peak MXU throughput); accumulation, bias add and ELU are
    always float32.
    """
    B, I = x.shape
    I2, O = w.shape
    assert I == I2 and b.shape == (O,)
    out_dtype = x.dtype

    if compute_dtype is not None and compute_dtype != x.dtype:
        x = x.astype(compute_dtype)
        w = w.astype(compute_dtype)
    in_itemsize = jnp.dtype(x.dtype).itemsize
    out_itemsize = jnp.dtype(out_dtype).itemsize

    # ---- Tile selection ------------------------------------------------------
    # Sublane packing: f32 -> 8 rows / vreg, bf16 -> 16, int8/fp8 -> 32.
    sublane = {4: 8, 2: 16, 1: 32}.get(in_itemsize, 8)
    # v6e/v7x MXU is 2x256x256: prefer 256-aligned N/K tiles when the problem
    # dim is large; small dims stay on the 128-lane minimum.
    n_align = 256 if O >= 512 else 128
    k_align = 256 if I >= 512 else 128

    tm = min(tm, _round_up(B, sublane))
    tn = min(tn, _round_up(O, n_align))
    tk = min(tk, _round_up(I, k_align))

    Bp = _round_up(B, tm)
    Ip = _round_up(I, tk)
    Op = _round_up(O, tn)

    # Megacore (v7x has 2 TensorCores): ensure the parallel (M, N) grid has at
    # least 2 tiles to shard, by splitting N while it stays 128-aligned.
    while (Bp // tm) * (Op // tn) < 2 and tn >= 256:
        tn = _round_up(tn // 2, 128)
        Op = _round_up(O, tn)

    # ---- Pad operands to tile multiples (skipped when already aligned) ------
    if (Bp, Ip) != (B, I):
        x = jnp.pad(x, ((0, Bp - B), (0, Ip - I)))
    if (Ip, Op) != (I, O):
        w = jnp.pad(w, ((0, Ip - I), (0, Op - O)))
    b2d = b.astype(jnp.float32)
    if Op != O:
        b2d = jnp.pad(b2d, (0, Op - O))
    b2d = b2d.reshape(1, Op)

    grid = (Bp // tm, Op // tn, Ip // tk)   # (M, N, K); K innermost.
    grid_m, grid_n, grid_k = grid

    # ---- VMEM budget (generation-aware cap) ----------------------------------
    vmem_needed = (2 * tm * tk * in_itemsize
                   + weight_buffers * tk * tn * in_itemsize
                   + 2 * tn * 4
                   + 2 * tm * tn * out_itemsize
                   + tm * tn * 4)
    try:
        vmem_phys = pltpu.get_tpu_info().vmem_capacity_bytes
    except Exception:
        vmem_phys = 64 * 1024 * 1024          # v7x-safe fallback
    # Leave ~25% headroom for Mosaic internal scratch:
    # ~48 MiB on v7x (64 MiB physical), ~96 MiB on v5e/v6e (128 MiB physical).
    vmem_cap = (3 * vmem_phys) // 4
    vmem_limit = int(min(vmem_cap, max(2 * vmem_needed, 16 * 1024 * 1024)))

    # ---- Cost estimate (accounts for operand re-streaming under this grid) ---
    cost = pl.CostEstimate(
        flops=2 * Bp * Ip * Op,
        transcendentals=Bp * Op,               # exp in the ELU epilogue
        bytes_accessed=(grid_n * Bp * Ip * in_itemsize    # x read per N tile
                        + grid_m * Ip * Op * in_itemsize  # w read per M tile
                        + grid_m * Op * 4                 # bias re-reads
                        + Bp * Op * out_itemsize),        # output written once
    )

    w_kwargs = {}
    if weight_buffers != 2:
        # Deeper weight pipelining for exposed-DMA (small-B / GEMV) regimes.
        w_kwargs["pipeline_mode"] = pl.Buffered(weight_buffers)

    out = pl.pallas_call(
        dense_elu_kernel,
        out_shape=jax.ShapeDtypeStruct((Bp, Op), out_dtype),
        grid_spec=pltpu.PrefetchScalarGridSpec(
            num_scalar_prefetch=0,
            grid=grid,
            in_specs=[
                pl.BlockSpec((tm, tk), lambda i, j, k: (i, k)),              # x
                pl.BlockSpec((tk, tn), lambda i, j, k: (k, j), **w_kwargs),  # w
                pl.BlockSpec((1, tn), lambda i, j, k: (0, j)),               # bias
            ],
            out_specs=pl.BlockSpec((tm, tn), lambda i, j, k: (i, j)),
            scratch_shapes=[pltpu.VMEM((tm, tn), jnp.float32)],
        ),
        compiler_params=pltpu.CompilerParams(
            dimension_semantics=("parallel", "parallel", "arbitrary"),
            vmem_limit_bytes=vmem_limit,
        ),
        cost_estimate=cost,
    )(x, w, b2d)

    if (Bp, Op) != (B, O):
        out = out[:B, :O]
    return out


def reference_dense_elu(x, w, b):
    y = jnp.dot(x, w, precision=jax.lax.Precision.HIGHEST) + b
    return jnp.where(y > 0, y, jnp.exp(y) - 1.0)


if __name__ == "__main__":
    key = jax.random.PRNGKey(0)
    k_x, k_w, k_b, k_x2, k_w2, k_b2, k_x3, k_w3, k_b3 = jax.random.split(key, 9)

    # 1) Small shapes matching Dense(i=32, o=64), batch 8 — f32, tight check.
    B, I, O = 8, 32, 64
    x = jax.random.normal(k_x, (B, I), dtype=jnp.float32)
    w = jax.random.normal(k_w, (I, O), dtype=jnp.float32) * (1.0 / jnp.sqrt(I))
    b = jax.random.normal(k_b, (O,), dtype=jnp.float32) * 0.1

    out = jax.block_until_ready(dense_elu(x, w, b))
    ref = reference_dense_elu(x, w, b)
    assert out.shape == (B, O)
    assert jnp.allclose(out, ref, atol=1e-5, rtol=1e-5), "f32 small mismatch"

    # 2) Non-aligned shapes: exercises padding, tile clamping and the
    #    megacore N-split (grid becomes (1, 2, 1)).
    B2, I2, O2 = 260, 200, 300
    x2 = jax.random.normal(k_x2, (B2, I2), dtype=jnp.float32)
    w2 = jax.random.normal(k_w2, (I2, O2), dtype=jnp.float32) * (1.0 / jnp.sqrt(I2))
    b2 = jax.random.normal(k_b2, (O2,), dtype=jnp.float32) * 0.1

    out2 = jax.block_until_ready(dense_elu(x2, w2, b2))
    ref2 = reference_dense_elu(x2, w2, b2)
    assert out2.shape == (B2, O2)
    assert jnp.allclose(out2, ref2, atol=2e-3, rtol=2e-3), "f32 tiled mismatch"

    # 3) bf16 MXU compute path (f32 accumulate + epilogue), aligned shapes
    #    (no pad / no slice), relaxed tolerance.
    B3, I3, O3 = 256, 512, 512
    x3 = jax.random.normal(k_x3, (B3, I3), dtype=jnp.float32)
    w3 = jax.random.normal(k_w3, (I3, O3), dtype=jnp.float32) * (1.0 / jnp.sqrt(I3))
    b3 = jax.random.normal(k_b3, (O3,), dtype=jnp.float32) * 0.1

    out3 = jax.block_until_ready(dense_elu(x3, w3, b3, compute_dtype=jnp.bfloat16))
    ref3 = reference_dense_elu(x3, w3, b3)
    assert out3.shape == (B3, O3)
    assert jnp.allclose(out3, ref3, atol=5e-2, rtol=5e-2), "bf16 path mismatch"

    print("KERNEL_OK")
</pallas_src>

<mosaic_0001>
module attributes {stable_mosaic.version = 11 : i64} {
  func.func @dense_elu_kernel(%arg0: i32, %arg1: i32, %arg2: i32, %arg3: memref<8x128xf32, #tpu.memory_space<vmem>>, %arg4: memref<128x128xf32, #tpu.memory_space<vmem>>, %arg5: memref<1x128xf32, #tpu.memory_space<vmem>>, %arg6: memref<8x128xf32, #tpu.memory_space<vmem>>, %arg7: memref<8x128xf32, #tpu.memory_space<vmem>>) attributes {dimension_semantics = [#tpu.dimension_semantics<parallel>, #tpu.dimension_semantics<parallel>, #tpu.dimension_semantics<arbitrary>], iteration_bounds = array<i64: 1, 1, 1>, scalar_prefetch = 0 : i64, scratch_operands = 1 : i64, tpu.core_type = #tpu.core_type<tc>, window_params = [{transform_indices = @transform_0, window_bounds = array<i64: 8, 128>}, {transform_indices = @transform_1, window_bounds = array<i64: 128, 128>}, {transform_indices = @transform_2, window_bounds = array<i64: 1, 128>}, {transform_indices = @transform_3, window_bounds = array<i64: 8, 128>}]} {
    %c0 = arith.constant 0 : index
    %c0_0 = arith.constant 0 : index
    %0 = vector.load %arg3[%c0, %c0_0] : memref<8x128xf32, #tpu.memory_space<vmem>>, vector<8x128xf32>
    %c0_1 = arith.constant 0 : index
    %c0_2 = arith.constant 0 : index
    %1 = vector.load %arg4[%c0_1, %c0_2] : memref<128x128xf32, #tpu.memory_space<vmem>>, vector<128x128xf32>
    %cst = arith.constant dense<0.000000e+00> : vector<8x128xf32>
    %2 = tpu.matmul %0, %1, %cst {dimension_numbers = #tpu.dot_dimension_numbers<[1], [0], [0], [1], [0, 0, 1, 1], [], []>} : vector<8x128xf32>, vector<128x128xf32>, vector<8x128xf32> -> vector<8x128xf32>
    %c0_i32 = arith.constant 0 : i32
    %3 = arith.cmpi eq, %arg2, %c0_i32 : i32
    %4 = arith.extui %3 : i1 to i32
    %c0_i32_3 = arith.constant 0 : i32
    %5 = arith.cmpi ne, %4, %c0_i32_3 : i32
    scf.if %5 {
      %c0_8 = arith.constant 0 : index
      %c0_9 = arith.constant 0 : index
      %12 = vector.load %arg5[%c0_8, %c0_9] : memref<1x128xf32, #tpu.memory_space<vmem>>, vector<1x128xf32>
      %13 = vector.broadcast %12 : vector<1x128xf32> to vector<8x128xf32>
      %14 = arith.addf %2, %13 : vector<8x128xf32>
      %c0_10 = arith.constant 0 : index
      %c0_11 = arith.constant 0 : index
      %15 = vector.load %arg7[%c0_10, %c0_11] : memref<8x128xf32, #tpu.memory_space<vmem>>, vector<8x128xf32>
      tpu.vector_store %arg7[%c0_10, %c0_11], %14 {strides = array<i32>} : memref<8x128xf32, #tpu.memory_space<vmem>>, vector<8x128xf32>,
    } else {
    }
    %c0_i32_4 = arith.constant 0 : i32
    %6 = arith.cmpi sgt, %arg2, %c0_i32_4 : i32
    %7 = arith.extui %6 : i1 to i32
    %c0_i32_5 = arith.constant 0 : i32
    %8 = arith.cmpi ne, %7, %c0_i32_5 : i32
    scf.if %8 {
      %c0_8 = arith.constant 0 : index
      %c0_9 = arith.constant 0 : index
      %12 = vector.load %arg7[%c0_8, %c0_9] : memref<8x128xf32, #tpu.memory_space<vmem>>, vector<8x128xf32>
      %13 = arith.addf %12, %2 : vector<8x128xf32>
      %c0_10 = arith.constant 0 : index
      %c0_11 = arith.constant 0 : index
      %14 = vector.load %arg7[%c0_10, %c0_11] : memref<8x128xf32, #tpu.memory_space<vmem>>, vector<8x128xf32>
      tpu.vector_store %arg7[%c0_10, %c0_11], %13 {strides = array<i32>} : memref<8x128xf32, #tpu.memory_space<vmem>>, vector<8x128xf32>,
    } else {
    }
    %c0_i32_6 = arith.constant 0 : i32
    %9 = arith.cmpi eq, %arg2, %c0_i32_6 : i32
    %10 = arith.extui %9 : i1 to i32
    %c0_i32_7 = arith.constant 0 : i32
    %11 = arith.cmpi ne, %10, %c0_i32_7 : i32
    scf.if %11 {
      %c0_8 = arith.constant 0 : index
      %c0_9 = arith.constant 0 : index
      %12 = vector.load %arg7[%c0_8, %c0_9] : memref<8x128xf32, #tpu.memory_space<vmem>>, vector<8x128xf32>
      %cst_10 = arith.constant 0.000000e+00 : f32
      %13 = vector.broadcast %cst_10 : f32 to vector<8x128xf32>
      %14 = arith.cmpf ogt, %12, %13 : vector<8x128xf32>
      %15 = math.exp %12 : vector<8x128xf32>
      %cst_11 = arith.constant 1.000000e+00 : f32
      %16 = vector.broadcast %cst_11 : f32 to vector<8x128xf32>
      %17 = arith.subf %15, %16 : vector<8x128xf32>
      %18 = arith.select %14, %12, %17 : vector<8x128xi1>, vector<8x128xf32>
      %c0_12 = arith.constant 0 : index
      %c0_13 = arith.constant 0 : index
      %19 = vector.load %arg6[%c0_12, %c0_13] : memref<8x128xf32, #tpu.memory_space<vmem>>, vector<8x128xf32>
      tpu.vector_store %arg6[%c0_12, %c0_13], %18 {strides = array<i32>} : memref<8x128xf32, #tpu.memory_space<vmem>>, vector<8x128xf32>,
    } else {
    }
    return
  }
  func.func @transform_0(%arg0: i32, %arg1: i32, %arg2: i32) -> (i32, i32) {
    %c0_i32 = arith.constant 0 : i32
    return %arg0, %arg2 : i32, i32
  }
  func.func @transform_1(%arg0: i32, %arg1: i32, %arg2: i32) -> (i32, i32) {
    %c0_i32 = arith.constant 0 : i32
    return %arg2, %arg1 : i32, i32
  }
  func.func @transform_2(%arg0: i32, %arg1: i32, %arg2: i32) -> (i32, i32) {
    %c0_i32 = arith.constant 0 : i32
    %c0_i32_0 = arith.constant 0 : i32
    return %c0_i32, %arg1 : i32, i32
  }
  func.func @transform_3(%arg0: i32, %arg1: i32, %arg2: i32) -> (i32, i32) {
    %c0_i32 = arith.constant 0 : i32
    return %arg0, %arg1 : i32, i32
  }
}

</mosaic_0001>

<bundles_post_ra>
// kernel: tpu_custom_call.1
= control target key start
LH: loop header
LB: loop body
LE: loop exit
PB: predicated region body
PF: predicated region fallthrough
CT: control target
= control target key end

     0   :  { %8 = vsyncpa [#allocation4], 0  ;;  %s408_s0 = inlined_call_operand.hbm [shape: f32[8,128], index: 0, kind: input, shape index: {}]   ;;  %s409_s1 = inlined_call_operand.hbm [shape: f32[128,128], index: 1, kind: input, shape index: {}]   ;;  %s410_s2 = inlined_call_operand.vmem [shape: f32[1,128], index: 2, kind: input, shape index: {}]   ;;  %s411_s3 = inlined_call_operand.hbm [shape: f32[8,128], index: 3, kind: output, shape index: {}]  }
   0x1   :  { %9 = vsyncpa [#allocation7], 0 }
   0x2   :  { %10 = vsyncpa [#allocation5], 0  ;;  %s334_s12 = smov [#allocation3]   ;;  %s335_s14 = smov [#allocation6]  }
   0x3   :  { %s17_s13 = sshll.u32 %s334_s12, 4  ;;  %s26_s15 = sshll.u32 %s335_s14, 4  ;;  %s18_s13 = int_to_ptr.vmem [resolvable:$true] %s17_s13  ;;  %s362_s15 = int_to_ptr.vmem [resolvable:$true] %s26_s15 }
   0x4   :  { %s262_s18 = scalar_lea.hbm %s408_s0, 128 }
   0x5   :  { %p263_p0 = scmp.ne.s32.totalorder %s408_s0, %s262_s18  ;;  %p266_p1 = scmp.lt.u32.totalorder %s262_s18, %s408_s0 }
   0x7   :  { %p268_p2 = pnand %p266_p1, %p263_p0 }
   0x9   :  { %271 = shalt.err (!%p268_p2)
}
   0xa   :  { %s272_s23 = scalar_lea.vmem %s18_s13, 128  ;;  %p277_p4 = scmp.lt.s32.totalorder %s18_s13, %s18_s13 }
   0xb   :  { %p273_p3 = scmp.ne.s32.totalorder %s18_s13, %s272_s23  ;;  %p278_p5 = scmp.lt.s32.totalorder %s272_s23, %s272_s23 }
   0xd   :  { %p279_p6 = por %p278_p5, %p277_p4 }
   0xf   :  { %p280_p7 = pnand %p279_p6, %p273_p3 }
  0x11   :  { %283 = shalt.err (!%p280_p7)
}
  0x12   :  { %20 = dma.hbm_to_vmem [thread:$0]  %s408_s0, 128, %s18_s13, [#allocation4]  }
  0x13   :  { %s284_s28 = scalar_lea.hbm %s409_s1, 2048 }
  0x14   :  { %p285_p8 = scmp.ne.s32.totalorder %s409_s1, %s284_s28  ;;  %p288_p9 = scmp.lt.u32.totalorder %s284_s28, %s409_s1 }
  0x16   :  { %p290_p10 = pnand %p288_p9, %p285_p8 }
  0x18   :  { %293 = shalt.err (!%p290_p10)
}
  0x19   :  { %s294_s6 = scalar_lea.vmem %s362_s15, 2048  ;;  %p299_p12 = scmp.lt.s32.totalorder %s362_s15, %s362_s15 }
  0x1a   :  { %p295_p11 = scmp.ne.s32.totalorder %s362_s15, %s294_s6  ;;  %p300_p13 = scmp.lt.s32.totalorder %s294_s6, %s294_s6 }
  0x1c   :  { %p301_p0 = por %p300_p13, %p299_p12 }
  0x1e   :  { %p302_p1 = pnand %p301_p0, %p295_p11 }
  0x20   :  { %305 = shalt.err (!%p302_p1)
}
  0x21   :  { %s336_s0 = smov 128   ;;  %s337_s7 = smov 8  }
  0x22   :  { %32 = dma.hbm_to_vmem [thread:$0]  %s409_s1, 2048, %s362_s15, [#allocation7], %s336_s0, %s336_s0, %s337_s7  }
  0x23   :  { %328 = dma.done.wait [#allocation4], 128  }
  0x24   :  { %329 = vsyncadd [#allocation4], 4294967168 }
  0x25   :  { %330 = dma.done.wait [#allocation7], 2048  }
  0x26   :  { %331 = vsyncadd [#allocation7], 4294965248  ;;  %v338_v0 = vmov 0.0|0.0   ;;  %vm339_vm0 = vmmov 0   ;;  %v340_v1 = vmov 0.0   ;;  %v42_v2 = vld [vmem:[#allocation6] sm:$0xff] }
  0x27   :  { %228 = vmatprep.subr.bf16.mxu0 %v338_v0  ;;  %225 = vmatprep.mubr.msk.f32.mxu0 %vm339_vm0, %v340_v1  ;;  %v43_v3 = vld [vmem:[#allocation6 + $0x8] sm:$0xff]  ;;  %v44_v4 = vld [vmem:[#allocation6 + $0x10] sm:$0xff]  ;;  %v45_v6 = vld [vmem:[#allocation6 + $0x18] sm:$0xff]  ;;  %s341_s11 = smov [#allocation8]  }
  0x28   :  { %v229_v5 = vpack.c.bf16 %v43_v3, %v42_v2  ;;  %v232_v7 = vpack.c.bf16 %v45_v6, %v44_v4  ;;  %v46_v8 = vld [vmem:[#allocation6 + $0x20] sm:$0xff]  ;;  %v47_v9 = vld [vmem:[#allocation6 + $0x28] sm:$0xff]  ;;  %v48_v11 = vld [vmem:[#allocation6 + $0x30] sm:$0xff]  ;;  %s164_s12 = sshll.u32 %s341_s11, 4  ;;  %s165_s12 = int_to_ptr.vmem [resolvable:$true] %s164_s12 }
  0x29   :  { %v235_v10 = vpack.c.bf16 %v47_v9, %v46_v8  ;;  %v49_v12 = vld [vmem:[#allocation6 + $0x38] sm:$0xff]  ;;  %v50_v14 = vld [vmem:[#allocation6 + $0x40] sm:$0xff]  ;;  %v51_v15 = vld [vmem:[#allocation6 + $0x48] sm:$0xff]  ;;  %s306_s13 = scalar_lea.vmem %s165_s12, 128  ;;  %p311_p3 = scmp.lt.s32.totalorder %s165_s12, %s165_s12 }
  0x2a   :  { %230 = vmatpush3.bf16.msra.mxu0 %v229_v5  ;;  %v238_v13 = vpack.c.bf16 %v49_v12, %v48_v11  ;;  %v241_v16 = vpack.c.bf16 %v51_v15, %v50_v14  ;;  %v52_v17 = vld [vmem:[#allocation6 + $0x50] sm:$0xff]  ;;  %v53_v18 = vld [vmem:[#allocation6 + $0x58] sm:$0xff]  ;;  %v54_v20 = vld [vmem:[#allocation6 + $0x60] sm:$0xff]  ;;  %p307_p2 = scmp.ne.s32.totalorder %s165_s12, %s306_s13  ;;  %p312_p4 = scmp.lt.s32.totalorder %s306_s13, %s306_s13 }
  0x2b   :  { %231 = vmatprep.subr.bf16.mxu0 %v338_v0  ;;  %v244_v19 = vpack.c.bf16 %v53_v18, %v52_v17  ;;  %v55_v21 = vld [vmem:[#allocation6 + $0x68] sm:$0xff]  ;;  %v56_v23 = vld [vmem:[#allocation6 + $0x70] sm:$0xff]  ;;  %v57_v24 = vld [vmem:[#allocation6 + $0x78] sm:$0xff] }
  0x2c   :  { %v247_v22 = vpack.c.bf16 %v55_v21, %v54_v20  ;;  %v250_v25 = vpack.c.bf16 %v57_v24, %v56_v23  ;;  %v41_v26 = vld [vmem:[#allocation3] sm:$0xff]  ;;  %p313_p5 = por %p312_p4, %p311_p3 }
  0x2d   :  { %v174_v27 = vld [vmem:[%s410_s2] ss:$0 sm:$0xff] }
  0x2e   :  { %233 = vmatpush3.bf16.msra.mxu0 %v232_v7  ;;  %p314_p6 = pnand %p313_p5, %p307_p2 }
  0x2f   :  { %234 = vmatprep.subr.bf16.mxu0 %v338_v0 }
  0x32   :  { %236 = vmatpush3.bf16.msra.mxu0 %v235_v10 }
  0x33   :  { %237 = vmatprep.subr.bf16.mxu0 %v338_v0 }
  0x36   :  { %239 = vmatpush3.bf16.msra.mxu0 %v238_v13 }
  0x37   :  { %240 = vmatprep.subr.bf16.mxu0 %v338_v0 }
  0x3a   :  { %242 = vmatpush3.bf16.msra.mxu0 %v241_v16 }
  0x3b   :  { %243 = vmatprep.subr.bf16.mxu0 %v338_v0 }
  0x3e   :  { %245 = vmatpush3.bf16.msra.mxu0 %v244_v19 }
  0x3f   :  { %246 = vmatprep.subr.bf16.mxu0 %v338_v0 }
  0x42   :  { %248 = vmatpush3.bf16.msra.mxu0 %v247_v22 }
  0x43   :  { %249 = vmatprep.subr.bf16.mxu0 %v338_v0 }
  0x46   :  { %251 = vmatpush3.bf16.msra.mxu0 %v250_v25 }
  0x49   :  { %226 = vmatmul.mubr.f32.vlgmr.msra.gmra.mrb[0].mxu0 %v41_v26 }
 0x11c   :  { %v124_v28 = vpop.f32.mrb[0].mxu0 }
 0x11d   :  { %v139_v29 = vadd.f32 %v174_v27, %v124_v28  ;;  %v227_v30 = vpop.f32.mrb[1].mxu0 }
 0x11f   :  { %v153_v31 = vmul.f32 1.442695, %v139_v29  ;;  %vm152_vm1 = vcmp.gt.f32.partialorder %v139_v29, 0.0 }
 0x121   :  { %260 = vpow2.f32 %v153_v31 }
 0x12b   :  { %v261_v32 = vpop.eup %260 }
 0x12c   :  { %v175_v33 = vadd.f32 -1.0, %v261_v32 }
 0x12e   :  { %v156_v34 = vsel %vm152_vm1, %v139_v29, %v175_v33 }
 0x12f   :  { %157 = vst [vmem:[#allocation8] sm:$0xff] %v156_v34 }
 0x130   :  { %317 = shalt.err (!%p314_p6)
}
 0x131   :  { %s318_s15 = scalar_lea.hbm %s411_s3, 128 }
 0x132   :  { %p319_p7 = scmp.ne.s32.totalorder %s411_s3, %s318_s15  ;;  %p322_p8 = scmp.lt.u32.totalorder %s318_s15, %s411_s3 }
 0x134   :  { %p324_p9 = pnand %p322_p8, %p319_p7 }
 0x136   :  { %327 = shalt.err (!%p324_p9)
}
 0x137   :  { %167 = dma.vmem_to_hbm [thread:$0]  %s165_s12, 128, %s411_s3, [#allocation5]  }
 0x138   :  { %332 = dma.done.wait [#allocation5], 128  }
 0x139   :  { %333 = vsyncadd [#allocation5], 4294967168 }
 0x13a   :  { %171 = vsyncpa [#allocation4], 1 }
 0x13b   :  { %172 = vsyncpa [#allocation7], 1 }
 0x13c   :  { %173 = vsyncpa [#allocation5], 1 }

</bundles_post_ra>
